<compile_context>
chip_gen: v6e
topology: v6e:2x2x1
jax: 0.10.0
libtpu: 0.0.40
codegen_flags: <defaults>
</compile_context>

<pallas_src>
import functools

import jax
import jax.numpy as jnp
from jax import lax
from jax.experimental import pallas as pl
from jax.experimental.pallas import tpu as pltpu

HIDDEN = 256
SUBLANE = 8
ROW_CHUNK = 128


def _round_up(x, m):
    return ((x + m - 1) // m) * m


def acs_actor_kernel(x_ref, w1_ref, b1_ref, w2_ref, b2_ref, out_ref,
                     *, rows, n_chunks):
    # Bias reads hoisted out of the unrolled chunk loop (JAX doesn't CSE them).
    b1 = b1_ref[...]
    b2 = b2_ref[...]

    def body(c, carry):
        r = pl.multiple_of(c * rows, rows)
        # Layer 1 on a `rows`-row slab: cast the f32 state chunk to bf16
        # in-register, matmul on the MXU with f32 accumulation.
        x_chunk = x_ref[pl.ds(r, rows), :].astype(jnp.bfloat16)
        h1 = jnp.dot(x_chunk, w1_ref[...], preferred_element_type=jnp.float32)
        h1 = jnp.maximum(h1 + b1, 0.0)
        # Layer 2 fused on the same slab -- no VMEM staging of h1.
        h2 = jnp.dot(h1.astype(jnp.bfloat16), w2_ref[...],
                     preferred_element_type=jnp.float32)
        h2 = jnp.maximum(h2 + b2, 0.0)
        out_ref[pl.ds(r, rows), :] = h2.astype(out_ref.dtype)
        return carry

    lax.fori_loop(0, n_chunks, body, 0, unroll=True)


def prepare_params(w1, b1, w2, b2):
    """One-time parameter conversion (hoisted out of the per-step forward):
    bf16 weights (stored as [in, out]), (1, 256) f32 bias rows."""
    return (w1.astype(jnp.bfloat16),
            b1.reshape(1, HIDDEN).astype(jnp.float32),
            w2.astype(jnp.bfloat16),
            b2.reshape(1, HIDDEN).astype(jnp.float32))


def acs_actor_forward(state, w1_bf16, b1_row, w2_bf16, b2_row, *,
                      block_b=512, out_dtype=jnp.float32):
    """state: (B, state_dim) f32; w1_bf16: (state_dim, 256) bf16;
    w2_bf16: (256, 256) bf16; b1_row, b2_row: (1, 256) f32.
    Returns relu(relu(state @ W1 + b1) @ W2 + b2) as (B, 256) `out_dtype`."""
    B, state_dim = state.shape

    # Tile selection:
    #  * small batches: one tile rounded up to the 8-sublane granule;
    #  * larger batches: tile is a multiple of the 128-row inner chunk,
    #    capped at block_b, and chosen so the grid has >= 2 tiles (both
    #    TensorCores on v7x get work via the "parallel" grid axis).
    if B <= ROW_CHUNK:
        tb = _round_up(B, SUBLANE)
        rows = tb
    else:
        tb = min(block_b, _round_up(pl.cdiv(B, 2), ROW_CHUNK))
        rows = ROW_CHUNK
    n_chunks = tb // rows
    grid = (pl.cdiv(B, tb),)

    kernel = functools.partial(acs_actor_kernel, rows=rows, n_chunks=n_chunks)

    return pl.pallas_call(
        kernel,
        out_shape=jax.ShapeDtypeStruct((B, HIDDEN), out_dtype),
        grid=grid,
        in_specs=[
            pl.BlockSpec((tb, state_dim), lambda i: (i, 0)),       # x: streams per tile
            pl.BlockSpec((state_dim, HIDDEN), lambda i: (0, 0)),   # W1: VMEM-resident
            pl.BlockSpec((1, HIDDEN), lambda i: (0, 0)),           # b1
            pl.BlockSpec((HIDDEN, HIDDEN), lambda i: (0, 0)),      # W2: VMEM-resident
            pl.BlockSpec((1, HIDDEN), lambda i: (0, 0)),           # b2
        ],
        out_specs=pl.BlockSpec((tb, HIDDEN), lambda i: (i, 0)),
        compiler_params=pltpu.CompilerParams(
            dimension_semantics=("parallel",),
        ),
    )(state, w1_bf16, b1_row, w2_bf16, b2_row)


def init_params(key, state_dim):
    """PyTorch nn.Linear-style init; weights stored as [in, out] (W.T)."""
    k1, k2, k3, k4 = jax.random.split(key, 4)
    bound1 = 1.0 / jnp.sqrt(state_dim)
    bound2 = 1.0 / jnp.sqrt(HIDDEN)
    w1 = jax.random.uniform(k1, (state_dim, HIDDEN), jnp.float32, -bound1, bound1)
    b1 = jax.random.uniform(k2, (HIDDEN,), jnp.float32, -bound1, bound1)
    w2 = jax.random.uniform(k3, (HIDDEN, HIDDEN), jnp.float32, -bound2, bound2)
    b2 = jax.random.uniform(k4, (HIDDEN,), jnp.float32, -bound2, bound2)
    return w1, b1, w2, b2


def _ref_bf16(state, w1, b1, w2, b2):
    """Reference with the same bf16-matmul / f32-accumulate arithmetic as the kernel."""
    h1 = jnp.dot(state.astype(jnp.bfloat16), w1.astype(jnp.bfloat16),
                 preferred_element_type=jnp.float32)
    h1 = jnp.maximum(h1 + b1, 0.0)
    h2 = jnp.dot(h1.astype(jnp.bfloat16), w2.astype(jnp.bfloat16),
                 preferred_element_type=jnp.float32)
    return jnp.maximum(h2 + b2, 0.0)


def _ref_f32(state, w1, b1, w2, b2):
    h1 = jnp.maximum(state @ w1 + b1, 0.0)
    return jnp.maximum(h1 @ w2 + b2, 0.0)


if __name__ == "__main__":
    key = jax.random.PRNGKey(0)
    k_state, k_params, k_big = jax.random.split(key, 3)

    state_dim = 32  # small RL-style state vector
    w1, b1, w2, b2 = init_params(k_params, state_dim)
    params = prepare_params(w1, b1, w2, b2)   # one-time weight prep (not per call)

    # --- small batch (single tile; raw f32 x streamed, no padding) ------------
    batch = 8
    state = jax.random.normal(k_state, (batch, state_dim), jnp.float32)
    out = jax.block_until_ready(acs_actor_forward(state, *params))
    assert out.shape == (batch, HIDDEN)
    assert jnp.allclose(out, _ref_bf16(state, w1, b1, w2, b2), atol=1e-3, rtol=1e-3)
    assert jnp.allclose(out, _ref_f32(state, w1, b1, w2, b2), atol=5e-2, rtol=5e-2)

    # --- larger batch: 2-tile grid with a masked partial edge tile ------------
    big_batch = 300
    state_big = jax.random.normal(k_big, (big_batch, state_dim), jnp.float32)
    out_big = jax.block_until_ready(acs_actor_forward(state_big, *params))
    assert out_big.shape == (big_batch, HIDDEN)
    assert jnp.allclose(out_big, _ref_bf16(state_big, w1, b1, w2, b2),
                        atol=1e-3, rtol=1e-3)

    print("KERNEL_OK")
</pallas_src>

<mosaic_0001>
module attributes {stable_mosaic.version = 11 : i64} {
  func.func @acs_actor_kernel(%arg0: i32, %arg1: memref<8x32xf32, #tpu.memory_space<vmem>>, %arg2: memref<32x256xbf16, #tpu.memory_space<vmem>>, %arg3: memref<1x256xf32, #tpu.memory_space<vmem>>, %arg4: memref<256x256xbf16, #tpu.memory_space<vmem>>, %arg5: memref<1x256xf32, #tpu.memory_space<vmem>>, %arg6: memref<8x256xf32, #tpu.memory_space<vmem>>) attributes {dimension_semantics = [#tpu.dimension_semantics<parallel>], iteration_bounds = array<i64: 1>, scalar_prefetch = 0 : i64, scratch_operands = 0 : i64, tpu.core_type = #tpu.core_type<tc>, window_params = [{transform_indices = @transform_0, window_bounds = array<i64: 8, 32>}, {pipeline_mode = #tpu.pipeline_mode<synchronous>, transform_indices = @transform_1, window_bounds = array<i64: 32, 256>}, {pipeline_mode = #tpu.pipeline_mode<synchronous>, transform_indices = @transform_2, window_bounds = array<i64: 1, 256>}, {pipeline_mode = #tpu.pipeline_mode<synchronous>, transform_indices = @transform_3, window_bounds = array<i64: 256, 256>}, {pipeline_mode = #tpu.pipeline_mode<synchronous>, transform_indices = @transform_4, window_bounds = array<i64: 1, 256>}, {transform_indices = @transform_5, window_bounds = array<i64: 8, 256>}]} {
    %c0 = arith.constant 0 : index
    %c0_0 = arith.constant 0 : index
    %0 = vector.load %arg3[%c0, %c0_0] : memref<1x256xf32, #tpu.memory_space<vmem>>, vector<1x256xf32>
    %c0_1 = arith.constant 0 : index
    %c0_2 = arith.constant 0 : index
    %1 = vector.load %arg5[%c0_1, %c0_2] : memref<1x256xf32, #tpu.memory_space<vmem>>, vector<1x256xf32>
    %c0_i32 = arith.constant 0 : i32
    %c8_i32 = arith.constant 8 : i32
    %2 = arith.muli %c0_i32, %c8_i32 : i32
    %3 = tpu.assume_multiple %2, 8 : i32
    %4 = arith.index_cast %3 : i32 to index
    %c0_3 = arith.constant 0 : index
    %5 = vector.load %arg1[%4, %c0_3] : memref<8x32xf32, #tpu.memory_space<vmem>>, vector<8x32xf32>
    %6 = arith.truncf %5 : vector<8x32xf32> to vector<8x32xbf16>
    %c0_4 = arith.constant 0 : index
    %c0_5 = arith.constant 0 : index
    %7 = vector.load %arg2[%c0_4, %c0_5] : memref<32x256xbf16, #tpu.memory_space<vmem>>, vector<32x256xbf16>
    %cst = arith.constant dense<0.000000e+00> : vector<8x256xf32>
    %8 = tpu.matmul %6, %7, %cst {dimension_numbers = #tpu.dot_dimension_numbers<[1], [0], [0], [1], [0, 0, 1, 1], [], []>} : vector<8x32xbf16>, vector<32x256xbf16>, vector<8x256xf32> -> vector<8x256xf32>
    %9 = vector.broadcast %0 : vector<1x256xf32> to vector<8x256xf32>
    %10 = arith.addf %8, %9 : vector<8x256xf32>
    %cst_6 = arith.constant 0.000000e+00 : f32
    %11 = vector.broadcast %cst_6 : f32 to vector<8x256xf32>
    %12 = arith.maximumf %10, %11 : vector<8x256xf32>
    %13 = arith.truncf %12 : vector<8x256xf32> to vector<8x256xbf16>
    %c0_7 = arith.constant 0 : index
    %c0_8 = arith.constant 0 : index
    %14 = vector.load %arg4[%c0_7, %c0_8] : memref<256x256xbf16, #tpu.memory_space<vmem>>, vector<256x256xbf16>
    %cst_9 = arith.constant dense<0.000000e+00> : vector<8x256xf32>
    %15 = tpu.matmul %13, %14, %cst_9 {dimension_numbers = #tpu.dot_dimension_numbers<[1], [0], [0], [1], [0, 0, 1, 1], [], []>} : vector<8x256xbf16>, vector<256x256xbf16>, vector<8x256xf32> -> vector<8x256xf32>
    %16 = vector.broadcast %1 : vector<1x256xf32> to vector<8x256xf32>
    %17 = arith.addf %15, %16 : vector<8x256xf32>
    %cst_10 = arith.constant 0.000000e+00 : f32
    %18 = vector.broadcast %cst_10 : f32 to vector<8x256xf32>
    %19 = arith.maximumf %17, %18 : vector<8x256xf32>
    %20 = arith.index_cast %3 : i32 to index
    %c0_11 = arith.constant 0 : index
    %21 = vector.load %arg6[%20, %c0_11] : memref<8x256xf32, #tpu.memory_space<vmem>>, vector<8x256xf32>
    tpu.vector_store %arg6[%20, %c0_11], %19 {strides = array<i32>} : memref<8x256xf32, #tpu.memory_space<vmem>>, vector<8x256xf32>,
    %c1_i32 = arith.constant 1 : i32
    return
  }
  func.func @transform_0(%arg0: i32) -> (i32, i32) {
    %c0_i32 = arith.constant 0 : i32
    %c0_i32_0 = arith.constant 0 : i32
    return %arg0, %c0_i32 : i32, i32
  }
  func.func @transform_1(%arg0: i32) -> (i32, i32) {
    %c0_i32 = arith.constant 0 : i32
    %c0_i32_0 = arith.constant 0 : i32
    %c0_i32_1 = arith.constant 0 : i32
    return %c0_i32, %c0_i32_0 : i32, i32
  }
  func.func @transform_2(%arg0: i32) -> (i32, i32) {
    %c0_i32 = arith.constant 0 : i32
    %c0_i32_0 = arith.constant 0 : i32
    %c0_i32_1 = arith.constant 0 : i32
    return %c0_i32, %c0_i32_0 : i32, i32
  }
  func.func @transform_3(%arg0: i32) -> (i32, i32) {
    %c0_i32 = arith.constant 0 : i32
    %c0_i32_0 = arith.constant 0 : i32
    %c0_i32_1 = arith.constant 0 : i32
    return %c0_i32, %c0_i32_0 : i32, i32
  }
  func.func @transform_4(%arg0: i32) -> (i32, i32) {
    %c0_i32 = arith.constant 0 : i32
    %c0_i32_0 = arith.constant 0 : i32
    %c0_i32_1 = arith.constant 0 : i32
    return %c0_i32, %c0_i32_0 : i32, i32
  }
  func.func @transform_5(%arg0: i32) -> (i32, i32) {
    %c0_i32 = arith.constant 0 : i32
    %c0_i32_0 = arith.constant 0 : i32
    return %arg0, %c0_i32 : i32, i32
  }
}

</mosaic_0001>

<bundles_post_ra>
// kernel: tpu_custom_call.1
= control target key start
LH: loop header
LB: loop body
LE: loop exit
PB: predicated region body
PF: predicated region fallthrough
CT: control target
= control target key end

     0   :  { %10 = vsyncpa [#allocation3], 0  ;;  %s655_s0 = inlined_call_operand.hbm [shape: f32[8,32], index: 0, kind: input, shape index: {}]   ;;  %s656_s1 = inlined_call_operand.hbm [shape: bf16[32,256], index: 1, kind: input, shape index: {}]   ;;  %s657_s2 = inlined_call_operand.vmem [shape: f32[1,256], index: 2, kind: input, shape index: {}]   ;;  %s658_s3 = inlined_call_operand.hbm [shape: bf16[256,256], index: 3, kind: input, shape index: {}]   ;;  %s659_s4 = inlined_call_operand.vmem [shape: f32[1,256], index: 4, kind: input, shape index: {}]   ;;  %s660_s5 = inlined_call_operand.hbm [shape: f32[8,256], index: 5, kind: output, shape index: {}]  }
   0x1   :  { %11 = vsyncpa [#allocation6], 0 }
   0x2   :  { %12 = vsyncpa [#allocation4], 0  ;;  %s600_s18 = smov [#allocation5]  }
   0x3   :  { %s28_s19 = sshll.u32 %s600_s18, 4  ;;  %s29_s19 = int_to_ptr.vmem [resolvable:$true] %s28_s19 }
   0x4   :  { %s522_s20 = scalar_lea.vmem %s29_s19, 512  ;;  %p527_p1 = scmp.lt.s32.totalorder %s29_s19, %s29_s19 }
   0x5   :  { %p523_p0 = scmp.ne.s32.totalorder %s29_s19, %s522_s20  ;;  %p528_p2 = scmp.lt.s32.totalorder %s522_s20, %s522_s20 }
   0x7   :  { %p529_p3 = por %p528_p2, %p527_p1 }
   0x9   :  { %p530_p4 = pnand %p529_p3, %p523_p0 }
   0xb   :  { %533 = shalt.err (!%p530_p4)
}
   0xc   :  { %s601_s21 = smov 128   ;;  %s602_s22 = smov 8  }
   0xd   :  { %34 = dma.hbm_to_vmem [thread:$0]  %s656_s1, 512, %s29_s19, [#allocation6], %s601_s21, %s601_s21, %s602_s22  }
   0xe   :  { %s603_s25 = smov [#allocation2]   ;;  %s604_s27 = smov [#allocation7]  }
   0xf   :  { %s19_s26 = sshll.u32 %s603_s25, 4  ;;  %s42_s28 = sshll.u32 %s604_s27, 4  ;;  %s20_s26 = int_to_ptr.vmem [resolvable:$true] %s19_s26  ;;  %s43_s28 = int_to_ptr.vmem [resolvable:$true] %s42_s28 }
  0x10   :  { %s542_s29 = scalar_lea.vmem %s20_s26, 128  ;;  %p547_p6 = scmp.lt.s32.totalorder %s20_s26, %s20_s26 }
  0x11   :  { %p543_p5 = scmp.ne.s32.totalorder %s20_s26, %s542_s29  ;;  %p548_p7 = scmp.lt.s32.totalorder %s542_s29, %s542_s29 }
  0x13   :  { %p549_p8 = por %p548_p7, %p547_p6 }
  0x15   :  { %p550_p9 = pnand %p549_p8, %p543_p5 }
  0x17   :  { %553 = shalt.err (!%p550_p9)
}
  0x18   :  { %22 = dma.hbm_to_vmem [thread:$0]  %s655_s0, 128, %s20_s26, [#allocation3]  }
  0x19   :  { %s562_s7 = scalar_lea.vmem %s43_s28, 4096  ;;  %p567_p11 = scmp.lt.s32.totalorder %s43_s28, %s43_s28 }
  0x1a   :  { %p563_p10 = scmp.ne.s32.totalorder %s43_s28, %s562_s7  ;;  %p568_p12 = scmp.lt.s32.totalorder %s562_s7, %s562_s7 }
  0x1c   :  { %p569_p13 = por %p568_p12, %p567_p11 }
  0x1e   :  { %p570_p0 = pnand %p569_p13, %p563_p10 }
  0x20   :  { %573 = shalt.err (!%p570_p0)
}
  0x21   :  { %48 = dma.hbm_to_vmem [thread:$0]  %s658_s3, 4096, %s43_s28, [#allocation6], %s601_s21, %s601_s21, %s602_s22  }
  0x22   :  { %594 = dma.done.wait [#allocation3], 128  }
  0x23   :  { %595 = vsyncadd [#allocation3], 4294967168 }
  0x24   :  { %596 = dma.done.wait [#allocation6], 4608  }
  0x25   :  { %597 = vsyncadd [#allocation6], 4294962688  ;;  %v605_v0 = vmov 0   ;;  %v460_v1 = vld [vmem:[#allocation5 + $0x14] ss:$8 sps:$4 sm:$0xff]   ;;  %vm100_vm0 = vcmask 261120   ;;  %v70_v39 = vlaneseq }
  0x26   :  { %136 = vmatprep.mubr.bf16.mxu0 %v605_v0  ;;  %v462_v2 = vld [vmem:[#allocation5 + $0x10] ss:$8 sps:$4 sm:$0xff]   ;;  %116 = vmatprep.subr.bf16.mxu0 %v460_v1  ;;  %v463_v3 = vld [vmem:[#allocation5 + $0x4] ss:$8 sps:$4 sm:$0xff]   ;;  %v465_v4 = vld [vmem:[#allocation5] ss:$8 sps:$4 sm:$0xff]  }
  0x27   :  { %v63_v5 = vld [vmem:[#allocation2] sm:$0xff]  ;;  %117 = vmatpush1.bf16.msra.mxu0 %v462_v2  ;;  %v469_v8 = vld [vmem:[#allocation7 + $0x64] ss:$8 sps:$4 sm:$0xff]   ;;  %v471_v10 = vld [vmem:[#allocation7 + $0x60] ss:$8 sps:$4 sm:$0xff]   ;;  %v71_v40 = vshrl.u32 %v70_v39, 7 }
  0x28   :  { %v466_v6 = vld [vmem:[#allocation7 + $0x74] ss:$8 sps:$4 sm:$0xff]   ;;  %118 = vmatprep.subr.bf16.mxu0 %v463_v3  ;;  %v468_v7 = vld [vmem:[#allocation7 + $0x70] ss:$8 sps:$4 sm:$0xff]   ;;  %v64_v9 = vpack.c.bf16 %v63_v5, %v63_v5  ;;  %v475_v13 = vld [vmem:[#allocation7 + $0x44] ss:$8 sps:$4 sm:$0xff]  }
  0x29   :  { %352 = vmatprep.subr.bf16.mxu1 %v466_v6  ;;  %v472_v11 = vld [vmem:[#allocation7 + $0x54] ss:$8 sps:$4 sm:$0xff]   ;;  %v474_v12 = vld [vmem:[#allocation7 + $0x50] ss:$8 sps:$4 sm:$0xff]   ;;  %v477_v14 = vld [vmem:[#allocation7 + $0x40] ss:$8 sps:$4 sm:$0xff]  }
  0x2a   :  { %353 = vmatpush1.bf16.msra.mxu1 %v468_v7  ;;  %v478_v15 = vld [vmem:[#allocation7 + $0x34] ss:$8 sps:$4 sm:$0xff]   ;;  %v480_v16 = vld [vmem:[#allocation7 + $0x30] ss:$8 sps:$4 sm:$0xff]   ;;  %v481_v17 = vld [vmem:[#allocation7 + $0x24] ss:$8 sps:$4 sm:$0xff]  }
  0x2b   :  { %119 = vmatpush1.bf16.msra.mxu0 %v465_v4  ;;  %354 = vmatprep.subr.bf16.mxu1 %v469_v8  ;;  %v483_v18 = vld [vmem:[#allocation7 + $0x20] ss:$8 sps:$4 sm:$0xff]   ;;  %v484_v19 = vld [vmem:[#allocation7 + $0x14] ss:$8 sps:$4 sm:$0xff]   ;;  %v486_v20 = vld [vmem:[#allocation7 + $0x10] ss:$8 sps:$4 sm:$0xff]  }
  0x2c   :  { %v487_v21 = vld [vmem:[#allocation7 + $0x4] ss:$8 sps:$4 sm:$0xff]   ;;  %v489_v22 = vld [vmem:[#allocation7] ss:$8 sps:$4 sm:$0xff]   ;;  %v490_v23 = vld [vmem:[#allocation7 + $0xf4] ss:$8 sps:$4 sm:$0xff]  }
  0x2d   :  { %v492_v24 = vld [vmem:[#allocation7 + $0xf0] ss:$8 sps:$4 sm:$0xff]   ;;  %v493_v25 = vld [vmem:[#allocation7 + $0xe4] ss:$8 sps:$4 sm:$0xff]   ;;  %v495_v26 = vld [vmem:[#allocation7 + $0xe0] ss:$8 sps:$4 sm:$0xff]  }
  0x2e   :  { %420 = vmatmul.mubr.msk.bf16.vlgmr.msra.gmra.mxu0 %vm100_vm0, %v64_v9  ;;  %355 = vmatpush1.bf16.msra.mxu1 %v471_v10  ;;  %v496_v27 = vld [vmem:[#allocation7 + $0xd4] ss:$8 sps:$4 sm:$0xff]   ;;  %v498_v28 = vld [vmem:[#allocation7 + $0xd0] ss:$8 sps:$4 sm:$0xff]   ;;  %v499_v29 = vld [vmem:[#allocation7 + $0xc4] ss:$8 sps:$4 sm:$0xff]  }
  0x2f   :  { %356 = vmatprep.subr.bf16.mxu1 %v472_v11  ;;  %v501_v30 = vld [vmem:[#allocation7 + $0xc0] ss:$8 sps:$4 sm:$0xff]   ;;  %v502_v31 = vld [vmem:[#allocation7 + $0xb4] ss:$8 sps:$4 sm:$0xff]   ;;  %v504_v32 = vld [vmem:[#allocation7 + $0xb0] ss:$8 sps:$4 sm:$0xff]  }
  0x30   :  { %v505_v33 = vld [vmem:[#allocation7 + $0xa4] ss:$8 sps:$4 sm:$0xff]   ;;  %v507_v34 = vld [vmem:[#allocation7 + $0xa0] ss:$8 sps:$4 sm:$0xff]   ;;  %v508_v35 = vld [vmem:[#allocation7 + $0x94] ss:$8 sps:$4 sm:$0xff]  }
  0x31   :  { %v510_v36 = vld [vmem:[#allocation7 + $0x90] ss:$8 sps:$4 sm:$0xff]   ;;  %v511_v37 = vld [vmem:[#allocation7 + $0x84] ss:$8 sps:$4 sm:$0xff]   ;;  %v513_v38 = vld [vmem:[#allocation7 + $0x80] ss:$8 sps:$4 sm:$0xff]  }
  0x32   :  { %357 = vmatpush1.bf16.msra.mxu1 %v474_v12  ;;  %v72_v41 = vsub.s32 0, %v71_v40  ;;  %v61_v42 = vld [vmem:[%s657_s2] sm:$0x3]  ;;  %v76_v43 = vsub.s32 1, %v71_v40  ;;  %s606_s2 = smov [#allocation8]  }
  0x33   :  { %358 = vmatprep.subr.bf16.mxu1 %v475_v13  ;;  %v62_v56 = vld [vmem:[%s659_s4] sm:$0x3]  ;;  %s406_s11 = sshll.u32 %s606_s2, 4  ;;  %s407_s11 = int_to_ptr.vmem [resolvable:$true] %s406_s11 }
  0x34   :  { %v73_v44 = vrot.slane %v61_v42, %v72_v41  ;;  %v77_v45 = vrot.slane %v61_v42, %v76_v43  ;;  %v185_v57 = vrot.slane %v62_v56, %v72_v41  ;;  %v189_v58 = vrot.slane %v62_v56, %v76_v43  ;;  %s574_s12 = scalar_lea.vmem %s407_s11, 256  ;;  %p579_p2 = scmp.lt.s32.totalorder %s407_s11, %s407_s11 }
  0x35   :  { %p575_p1 = scmp.ne.s32.totalorder %s407_s11, %s574_s12  ;;  %p580_p3 = scmp.lt.s32.totalorder %s574_s12, %s574_s12 }
  0x36   :  { %359 = vmatpush1.bf16.msra.mxu1 %v477_v14 }
  0x37   :  { %360 = vmatprep.subr.bf16.mxu1 %v478_v15  ;;  %p581_p4 = por %p580_p3, %p579_p2 }
  0x39   :  { %p582_p5 = pnand %p581_p4, %p575_p1 }
  0x3a   :  { %361 = vmatpush1.bf16.msra.mxu1 %v480_v16 }
  0x3b   :  { %362 = vmatprep.subr.bf16.mxu1 %v481_v17 }
  0x3e   :  { %363 = vmatpush1.bf16.msra.mxu1 %v483_v18 }
  0x3f   :  { %364 = vmatprep.subr.bf16.mxu1 %v484_v19 }
  0x42   :  { %365 = vmatpush1.bf16.msra.mxu1 %v486_v20 }
  0x43   :  { %366 = vmatprep.subr.bf16.mxu1 %v487_v21 }
  0x46   :  { %367 = vmatpush1.bf16.msra.mxu1 %v489_v22 }
  0x47   :  { %368 = vmatprep.subr.bf16.mxu1 %v490_v23 }
  0x4a   :  { %369 = vmatpush2.bf16.msra.mxu1 %v492_v24 }
  0x4b   :  { %370 = vmatprep.subr.bf16.mxu1 %v493_v25 }
  0x4e   :  { %371 = vmatpush2.bf16.msra.mxu1 %v495_v26 }
  0x4f   :  { %372 = vmatprep.subr.bf16.mxu1 %v496_v27 }
  0x52   :  { %373 = vmatpush2.bf16.msra.mxu1 %v498_v28 }
  0x53   :  { %374 = vmatprep.subr.bf16.mxu1 %v499_v29 }
  0x56   :  { %375 = vmatpush2.bf16.msra.mxu1 %v501_v30 }
  0x57   :  { %376 = vmatprep.subr.bf16.mxu1 %v502_v31 }
  0x5a   :  { %377 = vmatpush2.bf16.msra.mxu1 %v504_v32 }
  0x5b   :  { %378 = vmatprep.subr.bf16.mxu1 %v505_v33 }
  0x5e   :  { %379 = vmatpush2.bf16.msra.mxu1 %v507_v34 }
  0x5f   :  { %380 = vmatprep.subr.bf16.mxu1 %v508_v35 }
  0x62   :  { %381 = vmatpush2.bf16.msra.mxu1 %v510_v36 }
  0x63   :  { %382 = vmatprep.subr.bf16.mxu1 %v511_v37 }
  0x66   :  { %383 = vmatpush2.bf16.msra.mxu1 %v513_v38 }
  0xee   :  { %v138_v46 = vpop.f32.mrf.mxu0 }
  0xef   :  { %v139_v47 = vadd.f32 %v138_v46, %v73_v44 }
  0xf0   :  { %v140_v48 = vpop.f32.mrf.mxu0 }
  0xf1   :  { %v141_v49 = vadd.f32 %v140_v48, %v77_v45  ;;  %v145_v50 = vmax.f32 %v139_v47, 0.0 }
  0xf2   :  { %v142_v51 = vpop.f32.mrf.mxu0 }
  0xf3   :  { %v146_v52 = vmax.f32 %v141_v49, 0.0  ;;  %v147_v55 = vpack.c.bf16 %v145_v50, %v145_v50 }
  0xf4   :  { %v143_v53 = vpop.f32.mrf.mxu0 }
  0xf5   :  { %v148_v54 = vpack.c.bf16 %v146_v52, %v146_v52 }
  0xf7   :  { %384 = vmatprep.mubr.bf16.mxu1 %v148_v54 }
  0xf8   :  { %385 = vmatmul.mubr.bf16.vlgmr.msra.gmra.mxu1 %v147_v55 }
 0x1b8   :  { %v386_v59 = vpop.f32.mrf.mxu1 }
 0x1b9   :  { %v387_v60 = vadd.f32 %v386_v59, %v185_v57 }
 0x1ba   :  { %v388_v61 = vpop.f32.mrf.mxu1 }
 0x1bb   :  { %v393_v62 = vmax.f32 %v387_v60, 0.0  ;;  %v389_v63 = vadd.f32 %v388_v61, %v189_v58 }
 0x1bc   :  { %v390_v0 = vpop.f32.mrf.mxu1 }
 0x1bd   :  { %398 = vst [vmem:[#allocation8] sm:$0xff] %v393_v62  ;;  %v394_v1 = vmax.f32 %v389_v63, 0.0 }
 0x1be   :  { %v391_v2 = vpop.f32.mrf.mxu1 }
 0x1bf   :  { %399 = vst [vmem:[#allocation8 + $0x8] sm:$0xff] %v394_v1 }
 0x1c0   :  { %585 = shalt.err (!%p582_p5)
}
 0x1c1   :  { %409 = dma.vmem_to_hbm [thread:$0]  %s407_s11, 256, %s660_s5, [#allocation4]  }
 0x1c2   :  { %598 = dma.done.wait [#allocation4], 256  }
 0x1c3   :  { %599 = vsyncadd [#allocation4], 4294967040 }
 0x1c4   :  { %413 = vsyncpa [#allocation3], 1 }
 0x1c5   :  { %414 = vsyncpa [#allocation6], 1 }
 0x1c6   :  { %415 = vsyncpa [#allocation4], 1 }

</bundles_post_ra>
